<compile_context>
chip_gen: v7x
topology: tpu7x:2x2x1
jax: 0.10.0
libtpu: 0.0.40
codegen_flags: <defaults>
</compile_context>

<pallas_src>
import math

import jax
import jax.numpy as jnp
from jax.experimental import pallas as pl
from jax.experimental.pallas import tpu as pltpu


def _round_up(n, m):
    return ((n + m - 1) // m) * m


def _make_kernel(k):
    def kernel(x_ref, fp_ref, o_ref):
        # x_ref: (tb, k) timesteps; fp_ref: (2, dim) = [freqs; phases];
        # o_ref: (tb, k*dim) lane-packed output rows.
        x = x_ref[...].astype(jnp.float32)
        fp = fp_ref[...].astype(jnp.float32)
        freq = fp[0:1, :]                         # (1, dim)
        phase = fp[1:2, :]                        # (1, dim)
        if k == 1:
            arg = x * freq + phase                # (tb, dim)
        else:
            # Each piece is a cheap single-lane -> dim-lane VPU broadcast
            # (1 mul + 1 add); the lane-concat runs on the XLU slot, and the
            # expensive sin + the store are fully lane-dense.
            pieces = [x[:, j:j + 1] * freq + phase for j in range(k)]
            arg = jnp.concatenate(pieces, axis=-1)   # (tb, k*dim)
        o_ref[...] = jnp.sin(arg).astype(o_ref.dtype)
    return kernel


def sinusoidal_pos_emb(x, dim, *, out_dtype=jnp.float32,
                       target_block_bytes=2 << 20):
    """x: (B,) timesteps (any int/float dtype) -> (B, dim) embedding
    (== PyTorch SinusoidalPosEmb forward), output dtype `out_dtype`."""
    assert x.ndim == 1, "expected a 1-D vector of timesteps"
    assert dim % 2 == 0, "dim must be even"
    assert dim >= 4, "dim must be >= 4 (half_dim - 1 == 0 gives inf scale)"
    b = x.shape[0]
    half_dim = dim // 2

    # Hoisted constants: one (2, dim) array = [freqs, freqs] and [0, pi/2]
    # phases so the cos half is sin(arg + pi/2) and the kernel does one sin.
    scale = math.log(10000.0) / (half_dim - 1)
    freqs = jnp.exp(jnp.arange(half_dim, dtype=jnp.float32) * (-scale))
    freq_row = jnp.concatenate([freqs, freqs])
    phase_row = jnp.concatenate(
        [jnp.zeros((half_dim,), jnp.float32),
         jnp.full((half_dim,), math.pi / 2, dtype=jnp.float32)])
    fp = jnp.stack([freq_row, phase_row])                    # (2, dim)

    # Lane packing: fold k logical rows per 128-lane store row when dim < 128.
    k = max(1, 128 // dim) if dim < 128 else 1
    rows = -(-b // k)                                        # cdiv(b, k)
    b_pad = rows * k
    row_width = k * dim

    xk = x
    if b_pad != b:
        xk = jnp.pad(xk, (0, b_pad - b))                     # tiny (< k rows) 1-D pad
    xk = xk.reshape(rows, k)

    # Row tile: ~target_block_bytes output blocks (multiple of 8 rows); cap so
    # the "parallel" grid has >= 2 steps when there's enough work (v7x 2 TCs).
    out_bytes_per_row = row_width * jnp.dtype(out_dtype).itemsize
    if rows <= 8:
        tb = rows                                            # block == full dim, allowed
    else:
        tb = _round_up(min(rows, max(8, target_block_bytes // out_bytes_per_row)), 8)
        tb = min(tb, _round_up(-(-rows // 2), 8))
    grid = (pl.cdiv(rows, tb),)                              # ragged last block is masked

    out = pl.pallas_call(
        _make_kernel(k),
        out_shape=jax.ShapeDtypeStruct((rows, row_width), out_dtype),
        grid=grid,
        in_specs=[
            pl.BlockSpec((tb, k), lambda i: (i, 0)),         # timesteps, tiled over rows
            pl.BlockSpec((2, dim), lambda i: (0, 0)),        # freqs+phases, resident
        ],
        out_specs=pl.BlockSpec((tb, row_width), lambda i: (i, 0)),
        compiler_params=pltpu.CompilerParams(
            dimension_semantics=("parallel",),               # megacore / v7x sharding
            vmem_limit_bytes=32 << 20,                       # >= 2*block + slack, all gens
        ),
    )(xk, fp)

    out = out.reshape(b_pad, dim)                            # free row-major reshape
    return out[:b] if b_pad != b else out


def _reference(x, dim):
    half_dim = dim // 2
    scale = math.log(10000.0) / (half_dim - 1)
    freqs = jnp.exp(jnp.arange(half_dim, dtype=jnp.float32) * (-scale))
    arg = x.astype(jnp.float32)[:, None] * freqs[None, :]
    return jnp.concatenate([jnp.sin(arg), jnp.cos(arg)], axis=-1)


if __name__ == "__main__":
    key = jax.random.PRNGKey(0)

    # Deployment-like shape: lane-packed path (k = 128 // 32 = 4 rows / store row).
    B, DIM = 8, 32
    x = jax.random.uniform(key, (B,), dtype=jnp.float32) * 100.0
    out = jax.block_until_ready(sinusoidal_pos_emb(x, DIM))
    assert out.shape == (B, DIM) and out.dtype == jnp.float32
    # cos computed as sin(arg + pi/2): few-ulp difference for large args.
    assert jnp.allclose(out, _reference(x, DIM), atol=1e-4, rtol=1e-4)

    # Ragged batch + int32 timesteps (pad/slice path; output stays float32).
    x_int = jnp.arange(10, dtype=jnp.int32)
    out2 = jax.block_until_ready(sinusoidal_pos_emb(x_int, DIM))
    assert out2.shape == (10, DIM) and out2.dtype == jnp.float32
    assert jnp.allclose(out2, _reference(x_int, DIM), atol=1e-4, rtol=1e-4)

    # dim >= 128: unpacked (k == 1) path, multi-step grid.
    x3 = jax.random.normal(jax.random.PRNGKey(1), (16,), dtype=jnp.float32) * 10.0
    out3 = jax.block_until_ready(sinusoidal_pos_emb(x3, 128))
    assert out3.shape == (16, 128)
    assert jnp.allclose(out3, _reference(x3, 128), atol=1e-4, rtol=1e-4)

    print("KERNEL_OK")
</pallas_src>

<mosaic_0001>
module attributes {stable_mosaic.version = 11 : i64} {
  func.func @kernel(%arg0: i32, %arg1: memref<2x4xf32, #tpu.memory_space<vmem>>, %arg2: memref<2x32xf32, #tpu.memory_space<vmem>>, %arg3: memref<2x128xf32, #tpu.memory_space<vmem>>) attributes {dimension_semantics = [#tpu.dimension_semantics<parallel>], iteration_bounds = array<i64: 1>, scalar_prefetch = 0 : i64, scratch_operands = 0 : i64, tpu.core_type = #tpu.core_type<tc>, window_params = [{transform_indices = @transform_0, window_bounds = array<i64: 2, 4>}, {pipeline_mode = #tpu.pipeline_mode<synchronous>, transform_indices = @transform_1, window_bounds = array<i64: 2, 32>}, {transform_indices = @transform_2, window_bounds = array<i64: 2, 128>}]} {
    %c0 = arith.constant 0 : index
    %c0_0 = arith.constant 0 : index
    %0 = vector.load %arg1[%c0, %c0_0] : memref<2x4xf32, #tpu.memory_space<vmem>>, vector<2x4xf32>
    %c0_1 = arith.constant 0 : index
    %c0_2 = arith.constant 0 : index
    %1 = vector.load %arg2[%c0_1, %c0_2] : memref<2x32xf32, #tpu.memory_space<vmem>>, vector<2x32xf32>
    %2 = vector.extract_strided_slice %1 {offsets = [0, 0], sizes = [1, 32], strides = [1, 1]} : vector<2x32xf32> to vector<1x32xf32>
    %3 = vector.extract_strided_slice %1 {offsets = [1, 0], sizes = [1, 32], strides = [1, 1]} : vector<2x32xf32> to vector<1x32xf32>
    %4 = vector.extract_strided_slice %0 {offsets = [0, 0], sizes = [2, 1], strides = [1, 1]} : vector<2x4xf32> to vector<2x1xf32>
    %5 = vector.broadcast %4 : vector<2x1xf32> to vector<2x32xf32>
    %6 = vector.broadcast %2 : vector<1x32xf32> to vector<2x32xf32>
    %7 = arith.mulf %5, %6 : vector<2x32xf32>
    %8 = vector.broadcast %3 : vector<1x32xf32> to vector<2x32xf32>
    %9 = arith.addf %7, %8 : vector<2x32xf32>
    %10 = vector.extract_strided_slice %0 {offsets = [0, 1], sizes = [2, 1], strides = [1, 1]} : vector<2x4xf32> to vector<2x1xf32>
    %11 = vector.broadcast %10 : vector<2x1xf32> to vector<2x32xf32>
    %12 = vector.broadcast %2 : vector<1x32xf32> to vector<2x32xf32>
    %13 = arith.mulf %11, %12 : vector<2x32xf32>
    %14 = vector.broadcast %3 : vector<1x32xf32> to vector<2x32xf32>
    %15 = arith.addf %13, %14 : vector<2x32xf32>
    %16 = vector.extract_strided_slice %0 {offsets = [0, 2], sizes = [2, 1], strides = [1, 1]} : vector<2x4xf32> to vector<2x1xf32>
    %17 = vector.broadcast %16 : vector<2x1xf32> to vector<2x32xf32>
    %18 = vector.broadcast %2 : vector<1x32xf32> to vector<2x32xf32>
    %19 = arith.mulf %17, %18 : vector<2x32xf32>
    %20 = vector.broadcast %3 : vector<1x32xf32> to vector<2x32xf32>
    %21 = arith.addf %19, %20 : vector<2x32xf32>
    %22 = vector.extract_strided_slice %0 {offsets = [0, 3], sizes = [2, 1], strides = [1, 1]} : vector<2x4xf32> to vector<2x1xf32>
    %23 = vector.broadcast %22 : vector<2x1xf32> to vector<2x32xf32>
    %24 = vector.broadcast %2 : vector<1x32xf32> to vector<2x32xf32>
    %25 = arith.mulf %23, %24 : vector<2x32xf32>
    %26 = vector.broadcast %3 : vector<1x32xf32> to vector<2x32xf32>
    %27 = arith.addf %25, %26 : vector<2x32xf32>
    %28 = tpu.concatenate %9, %15, %21, %27 in 1 : vector<2x32xf32>, vector<2x32xf32>, vector<2x32xf32>, vector<2x32xf32> -> vector<2x128xf32>
    %29 = math.sin %28 : vector<2x128xf32>
    %c0_3 = arith.constant 0 : index
    %c0_4 = arith.constant 0 : index
    %30 = vector.load %arg3[%c0_3, %c0_4] : memref<2x128xf32, #tpu.memory_space<vmem>>, vector<2x128xf32>
    tpu.vector_store %arg3[%c0_3, %c0_4], %29 {strides = array<i32>} : memref<2x128xf32, #tpu.memory_space<vmem>>, vector<2x128xf32>,
    return
  }
  func.func @transform_0(%arg0: i32) -> (i32, i32) {
    %c0_i32 = arith.constant 0 : i32
    %c0_i32_0 = arith.constant 0 : i32
    return %arg0, %c0_i32 : i32, i32
  }
  func.func @transform_1(%arg0: i32) -> (i32, i32) {
    %c0_i32 = arith.constant 0 : i32
    %c0_i32_0 = arith.constant 0 : i32
    %c0_i32_1 = arith.constant 0 : i32
    return %c0_i32, %c0_i32_0 : i32, i32
  }
  func.func @transform_2(%arg0: i32) -> (i32, i32) {
    %c0_i32 = arith.constant 0 : i32
    %c0_i32_0 = arith.constant 0 : i32
    return %arg0, %c0_i32 : i32, i32
  }
}

</mosaic_0001>

<bundles_post_ra>
// kernel: tpu_custom_call.1
= control target key start
LH: loop header
LB: loop body
LE: loop exit
PB: predicated region body
PF: predicated region fallthrough
CT: control target
= control target key end

     0   :  { %7 = vsyncpa [#allocation3], 0  ;;  %s355_s0 = inlined_call_operand.hbm [shape: f32[2,4], index: 0, kind: input, shape index: {}]   ;;  %s356_s1 = inlined_call_operand.vmem [shape: f32[2,32], index: 1, kind: input, shape index: {}]   ;;  %s357_s2 = inlined_call_operand.hbm [shape: f32[2,128], index: 2, kind: output, shape index: {}]  }
   0x1   :  { %8 = vsyncpa [#allocation4], 0  ;;  %s277_s9 = smov [#allocation2]   ;;  %s229_s13 = scalar_lea.hbm %s355_s0, 32 }
   0x2   :  { %s15_s10 = sshll.u32 %s277_s9, 4  ;;  %p230_p0 = scmp.ne.s32.totalorder %s355_s0, %s229_s13  ;;  %s16_s10 = int_to_ptr.vmem [resolvable:$true] %s15_s10 }
   0x3   :  { %p233_p1 = scmp.lt.u32.totalorder %s229_s13, %s355_s0 }
   0x5   :  { %p235_p2 = pnand %p233_p1, %p230_p0 }
   0x7   :  { %238 = shalt.err (!%p235_p2)
}
   0x8   :  { %s239_s18 = scalar_lea.vmem %s16_s10, 32  ;;  %p244_p4 = scmp.lt.s32.totalorder %s16_s10, %s16_s10 }
   0x9   :  { %p240_p3 = scmp.ne.s32.totalorder %s16_s10, %s239_s18  ;;  %p245_p5 = scmp.lt.s32.totalorder %s239_s18, %s239_s18 }
   0xb   :  { %p246_p6 = por %p245_p5, %p244_p4 }
   0xd   :  { %p247_p7 = pnand %p246_p6, %p240_p3 }
   0xf   :  { %250 = shalt.err (!%p247_p7)
}
  0x10   :  { %18 = dma.hbm_to_vmem [thread:$0]  %s355_s0, 32, %s16_s10, [#allocation3]  }
  0x11   :  { %273 = dma.done.wait [#allocation3], 32  }
  0x12   :  { %274 = vsyncadd [#allocation3], 4294967264  ;;  %v278_v0 = vmov 1   ;;  %v279_v1 = vmov 3   ;;  %v24_v2 = vld [vmem:[#allocation2] sm:$0x3]  ;;  %v31_v5 = vlaneseq }
  0x13   :  { %220 = vset.pattern.permute.xlu0 %v278_v0  ;;  %222 = vset.pattern.permute.xlu1 %v279_v1  ;;  %v280_v3 = vmov 2   ;;  %v281_v4 = vmov 0   ;;  %v25_v8 = vld [vmem:[%s356_s1] sm:$0x3]  ;;  %s282_s22 = smov 32   ;;  %s283_s23 = smov 96  }
  0x14   :  { %42 = vperm.xlu0 %220, %v24_v2   ;;  %54 = vperm.xlu1 %222, %v24_v2   ;;  %v32_v6 = vshrl.u32 %v31_v5, 7  ;;  %s284_s1 = smov 64   ;;  %vm71_vm0 = vcmask 261120   ;;  %vm73_vm1 = vcmask 523264   ;;  %vm75_vm2 = vcmask 785408   ;;  %s291_s24 = smov [#allocation5]  }
  0x15   :  { %v285_v40 = vmov 683565275   ;;  %v286_v42 = vmov 2475754826   ;;  %v287_v45 = vmov 2131351028  }
  0x16   :  { %v33_v7 = vsub.s32 0, %v32_v6  ;;  %v38_v9 = vsub.s32 1, %v32_v6  ;;  %v288_v48 = vmov 2102212464   ;;  %v289_v51 = vmov 920167782  }
  0x17   :  { %v290_v54 = vmov 1326507024   ;;  %s188_s25 = sshll.u32 %s291_s24, 4  ;;  %s189_s25 = int_to_ptr.vmem [resolvable:$true] %s188_s25 }
  0x18   :  { %221 = vset.pattern.permute.xlu0 %v280_v3  ;;  %223 = vset.pattern.permute.xlu1 %v281_v4  ;;  %v34_v10 = vrot.slane %v25_v8, %v33_v7  ;;  %v39_v11 = vrot.slane %v25_v8, %v38_v9  ;;  %s251_s26 = scalar_lea.vmem %s189_s25, 32  ;;  %p256_p9 = scmp.lt.s32.totalorder %s189_s25, %s189_s25 }
  0x19   :  { %48 = vperm.xlu0 %221, %v24_v2   ;;  %28 = vperm.xlu1 %223, %v24_v2   ;;  %p252_p8 = scmp.ne.s32.totalorder %s189_s25, %s251_s26  ;;  %p257_p10 = scmp.lt.s32.totalorder %s251_s26, %s251_s26 }
  0x1b   :  { %p258_p11 = por %p257_p10, %p256_p9 }
  0x1d   :  { %224 = vset.pattern.permute.xlu0 %v279_v1  ;;  %p259_p12 = pnand %p258_p11, %p252_p8 }
  0x93   :  { %v43_v12 = vpop.permute.xlu0 %42  ;;  %v55_v13 = vpop.permute.xlu1 %54 }
  0x94   :  { %v45_v14 = vmul.f32 %v43_v12, %v34_v10  ;;  %v57_v15 = vmul.f32 %v55_v13, %v34_v10 }
  0x96   :  { %v46_v16 = vadd.f32 %v45_v14, %v39_v11  ;;  %v58_v18 = vadd.f32 %v57_v15, %v39_v11 }
  0x98   :  { %60 = vrot.lane.b32.xlu1 %v46_v16, %s282_s22  ;;  %v49_v17 = vpop.permute.xlu0 %48  ;;  %v29_v19 = vpop.permute.xlu1 %28 }
  0x99   :  { %v51_v20 = vmul.f32 %v49_v17, %v34_v10  ;;  %v35_v21 = vmul.f32 %v34_v10, %v29_v19 }
  0x9b   :  { %v52_v22 = vadd.f32 %v51_v20, %v39_v11  ;;  %v40_v23 = vadd.f32 %v39_v11, %v35_v21 }
  0x9c   :  { %68 = vrot.lane.b32.xlu1 %v58_v18, %s283_s23 }
  0x9d   :  { %64 = vrot.lane.b32.xlu0 %v52_v22, %s284_s1 }
 0x10a   :  { %v61_v24 = vpop.permute.xlu1 %60 }
 0x10b   :  { %v72_v26 = vsel %vm71_vm0, %v40_v23, %v61_v24 }
 0x10e   :  { %v69_v25 = vpop.permute.xlu1 %68 }
 0x10f   :  { %v65_v27 = vpop.permute.xlu0 %64 }
 0x110   :  { %v74_v28 = vsel %vm73_vm1, %v72_v26, %v65_v27 }
 0x111   :  { %v322_v29 = vsel %vm75_vm2, %v74_v28, %v69_v25 }
 0x112   :  { %v80_v30 = vand.u32 2139095040, %v322_v29  ;;  %v77_v34 = vand.u32 2147483647, %v322_v29  ;;  %vm79_vm10 = vcmp.lt.s32.totalorder %v322_v29, 0  ;;  %vm169_vm15 = vweird.f32 %v322_v29 }
 0x114   :  { %v81_v31 = vshrl.u32 %v80_v30, 23  ;;  %v84_v37 = vand.u32 8388607, %v77_v34  ;;  %vm78_vm11 = vcmp.le.f32.partialorder %v77_v34, 0.7853982 }
 0x116   :  { %v197_v32 = vadd.s32 4294967169, %v81_v31  ;;  %v85_v56 = vor.u32 8388608, %v84_v37 }
 0x118   :  { %v87_v33 = vadd.s32 1, %v197_v32  ;;  %v125_v6 = vshll.u32 %v85_v56, 8 }
 0x11a   :  { %vm88_vm3 = vcmp.gt.s32.totalorder %v87_v33, 0 }
 0x11b   :  { %v89_v35 = vsel %vm88_vm3, %v87_v33, 0 }
 0x11c   :  { %v91_v36 = vand.u32 31, %v89_v35  ;;  %v90_v39 = vshrl.u32 %v89_v35, 5 }
 0x11e   :  { %v92_v38 = vsub.s32 32, %v91_v36  ;;  %v94_v41 = vshll.u32 %v285_v40, %v91_v36  ;;  %v97_v43 = vshll.u32 %v286_v42, %v91_v36  ;;  %v100_v47 = vshll.u32 %v287_v45, %v91_v36 }
 0x11f   :  { %v103_v50 = vshll.u32 %v288_v48, %v91_v36  ;;  %v106_v53 = vshll.u32 %v289_v51, %v91_v36  ;;  %vm109_vm4 = vcmp.lt.s32.totalorder %v90_v39, 1  ;;  %vm112_vm5 = vcmp.lt.s32.totalorder %v90_v39, 4 }
 0x120   :  { %v95_v44 = vshrl.u32 %v286_v42, %v92_v38  ;;  %v98_v46 = vshrl.u32 %v287_v45, %v92_v38  ;;  %v101_v49 = vshrl.u32 %v288_v48, %v92_v38  ;;  %v104_v52 = vshrl.u32 %v289_v51, %v92_v38 }
 0x121   :  { %v107_v55 = vshrl.u32 %v290_v54, %v92_v38  ;;  %v93_v1 = vshrl.u32 %v285_v40, %v92_v38  ;;  %vm111_vm6 = vcmp.lt.s32.totalorder %v90_v39, 3  ;;  %vm110_vm7 = vcmp.lt.s32.totalorder %v90_v39, 2 }
 0x122   :  { %v96_v57 = vor.u32 %v95_v44, %v94_v41  ;;  %v99_v58 = vor.u32 %v98_v46, %v97_v43  ;;  %v102_v59 = vor.u32 %v101_v49, %v100_v47  ;;  %v105_v60 = vor.u32 %v104_v52, %v103_v50 }
 0x123   :  { %v108_v61 = vor.u32 %v107_v55, %v106_v53 }
 0x124   :  { %v114_v62 = vsel %vm112_vm5, %v102_v59, 2102212464  ;;  %v117_v63 = vsel %vm109_vm4, %v96_v57, %v99_v58  ;;  %v121_v0 = vsel %vm109_vm4, %v99_v58, %v102_v59  ;;  %v118_v2 = vsel %vm112_vm5, %v105_v60, 920167782 }
 0x125   :  { %v122_v3 = vsel %vm112_vm5, %v108_v61, 1326507024  ;;  %v119_v4 = vsel %vm111_vm6, %v102_v59, %v118_v2  ;;  %v113_v7 = vsel %vm109_vm4, %v93_v1, %v96_v57  ;;  %v115_v8 = vsel %vm111_vm6, %v99_v58, %v114_v62 }
 0x126   :  { %v123_v5 = vsel %vm111_vm6, %v105_v60, %v122_v3  ;;  %v120_v9 = vsel %vm110_vm7, %v117_v63, %v119_v4  ;;  %v116_v15 = vsel %vm110_vm7, %v113_v7, %v115_v8 }
 0x127   :  { %v124_v10 = vsel %vm110_vm7, %v121_v0, %v123_v5  ;;  %v331_v13 = vmul.u32.u64.low %v125_v6, %v120_v9  ;;  %v332_v14 = vmul.u32.u64.high %v125_v6, %v120_v9, %v331_v13  ;;  %v132_v17 = vmul.u32 %v125_v6, %v116_v15 }
 0x128   :  { %v328_v11 = vmul.u32.u64.low %v125_v6, %v124_v10  ;;  %v329_v12 = vmul.u32.u64.high %v125_v6, %v124_v10, %v328_v11 }
 0x129   :  { %v135_v16 = vadd.s32 1, %v332_v14 }
 0x12a   :  { %vm134_vm8 = vc.u32 %v329_v12, %v331_v13  ;;  %v133_v30 = vadd.s32 %v331_v13, %v329_v12 }
 0x12b   :  { %v136_v18 = vsel %vm134_vm8, %v135_v16, %v332_v14 }
 0x12c   :  { %v137_v19 = vadd.s32 %v136_v18, %v132_v17 }
 0x12e   :  { %v138_v20 = vadd.s32 536870912, %v137_v19 }
 0x130   :  { %v139_v21 = vshrl.u32 %v138_v20, 30 }
 0x132   :  { %v140_v22 = vshll.u32 %v139_v21, 30  ;;  %v163_v43 = vsub.s32 4, %v139_v21 }
 0x134   :  { %v141_v23 = vsub.s32 %v137_v19, %v140_v22  ;;  %v164_v46 = vsel %vm79_vm10, %v163_v43, %v139_v21 }
 0x135   :  { %v166_v48 = vsel %vm78_vm11, 0, %v164_v46 }
 0x136   :  { %v143_v24 = vsub.s32 0, %v141_v23  ;;  %v170_v49 = vadd.s32 3, %v166_v48 }
 0x138   :  { %v198_v25 = vmin.u32 %v143_v24, %v141_v23  ;;  %v171_v50 = vand.u32 3, %v170_v49 }
 0x13a   :  { %v145_v26 = vclz %v198_v25  ;;  %vm176_vm12 = vcmp.eq.s32.totalorder %v171_v50, 2  ;;  %vm173_vm13 = vcmp.eq.s32.totalorder %v171_v50, 0  ;;  %vm172_vm14 = vcmp.lt.s32.totalorder %v171_v50, 2 }
 0x13c   :  { %v199_v27 = vadd.s32 4294967294, %v145_v26 }
 0x13e   :  { %vm200_vm9 = vcmp.lt.s32.totalorder %v199_v27, 0 }
 0x13f   :  { %v148_v28 = vsel %vm200_vm9, 0, %v199_v27 }
 0x140   :  { %v149_v31 = vsub.s32 32, %v148_v28  ;;  %v153_v32 = vsub.s32 4294967266, %v148_v28  ;;  %v150_v33 = vshll.u32 %v141_v23, %v148_v28 }
 0x142   :  { %v151_v35 = vshrl.u32 %v133_v30, %v149_v31  ;;  %v154_v36 = vadd.s32 127, %v153_v32 }
 0x144   :  { %v152_v37 = vor.u32 %v151_v35, %v150_v33  ;;  %v155_v38 = vshll.u32 %v154_v36, 23 }
 0x146   :  { %v156_v39 = vor.u32 4788187, %v155_v38  ;;  %v159_v41 = vcvt.s32.f32 %v152_v37 }
 0x148   :  { %v157_v40 = vand.u32 2147483647, %v156_v39 }
 0x14a   :  { %v160_v42 = vmul.f32 %v159_v41, %v157_v40 }
 0x14c   :  { %v161_v44 = vxor.u32 2147483648, %v160_v42 }
 0x14e   :  { %v162_v45 = vsel %vm79_vm10, %v161_v44, %v160_v42 }
 0x14f   :  { %v165_v47 = vsel %vm78_vm11, %v322_v29, %v162_v45 }
 0x150   :  { %225 = vcosq.f32 %v165_v47 }
 0x151   :  { %227 = vsinq.f32 %v165_v47 }
 0x15a   :  { %v226_v51 = vpop.eup %225 }
 0x15b   :  { %v228_v52 = vpop.eup %227  ;;  %v177_v53 = vxor.u32 2147483648, %v226_v51 }
 0x15c   :  { %v174_v54 = vxor.u32 2147483648, %v228_v52 }
 0x15d   :  { %v178_v55 = vsel %vm176_vm12, %v177_v53, %v228_v52 }
 0x15e   :  { %v175_v34 = vsel %vm173_vm13, %v226_v51, %v174_v54 }
 0x15f   :  { %v179_v56 = vsel %vm172_vm14, %v175_v34, %v178_v55 }
 0x160   :  { %v180_v57 = vsel %vm169_vm15, nan, %v179_v56 }
 0x161   :  { %181 = vst [vmem:[#allocation5] sm:$0x3] %v180_v57 }
 0x162   :  { %262 = shalt.err (!%p259_p12)
}
 0x163   :  { %s263_s29 = scalar_lea.hbm %s357_s2, 32 }
 0x164   :  { %p264_p13 = scmp.ne.s32.totalorder %s357_s2, %s263_s29  ;;  %p267_p0 = scmp.lt.u32.totalorder %s263_s29, %s357_s2 }
 0x166   :  { %p269_p1 = pnand %p267_p0, %p264_p13 }
 0x168   :  { %272 = shalt.err (!%p269_p1)
}
 0x169   :  { %191 = dma.vmem_to_hbm [thread:$0]  %s189_s25, 32, %s357_s2, [#allocation4]  }
 0x16a   :  { %275 = dma.done.wait [#allocation4], 32  }
 0x16b   :  { %276 = vsyncadd [#allocation4], 4294967264 }
 0x16c   :  { %195 = vsyncpa [#allocation3], 1 }
 0x16d   :  { %196 = vsyncpa [#allocation4], 1 }

</bundles_post_ra>
